<compile_context>
chip_gen: v7x
topology: tpu7x:2x2x1
jax: 0.10.0
libtpu: 0.0.40
codegen_flags: <defaults>
</compile_context>

<pallas_src>
import functools

import jax
import jax.numpy as jnp
from jax.experimental import pallas as pl
from jax.experimental.pallas import tpu as pltpu


def ffn_kernel(x_ref, w1_ref, b1_ref, w2_ref, b2_ref, o_ref, acc_ref):
    # x_ref : (tm, d_model)      compute dtype (bf16)
    # w1_ref: (d_model, tk)      compute dtype
    # b1_ref: (1, tk)            f32
    # w2_ref: (tk, d_model)      compute dtype
    # b2_ref: (1, d_model)       f32
    # o_ref : (tm, d_model)      output dtype
    # acc_ref: (tm, d_model)     f32 VMEM accumulator (resident across k)
    k = pl.program_id(1)

    @pl.when(k == 0)
    def _init():
        acc_ref[...] = jnp.zeros_like(acc_ref)

    # First GEMM chunk: (tm, d_model) @ (d_model, tk) -> (tm, tk), f32 acc on MXU.
    h = jnp.dot(x_ref[...], w1_ref[...], preferred_element_type=jnp.float32)
    h = jnp.maximum(h + b1_ref[...], 0.0)  # bias + ReLU in f32 on the VPU
    # TODO(synk): dropout is identity (eval/inference mode); training-mode
    # stochastic masking via pltpu.prng_seed/prng_random_bits is not implemented.

    # Second GEMM chunk, accumulated over the d_ff reduction axis.
    acc_ref[...] += jnp.dot(h.astype(w2_ref.dtype), w2_ref[...],
                            preferred_element_type=jnp.float32)

    @pl.when(k == pl.num_programs(1) - 1)
    def _finalize():
        o_ref[...] = (acc_ref[...] + b2_ref[...]).astype(o_ref.dtype)


def prepare_ffn_params(w1, b1, w2, b2, compute_dtype=jnp.bfloat16):
    """One-time conversion of PyTorch nn.Linear params (out_features, in_features)
    to MXU-friendly (in_features, out_features) layout + compute dtype.
    Call this OUTSIDE the per-step hot path so the transposes/casts are not
    re-materialized on every forward call."""
    w1_t = jnp.asarray(w1.T, dtype=compute_dtype)            # (d_model, d_ff)
    w2_t = jnp.asarray(w2.T, dtype=compute_dtype)            # (d_ff, d_model)
    b1_row = jnp.asarray(b1, dtype=jnp.float32).reshape(1, -1)   # (1, d_ff)
    b2_row = jnp.asarray(b2, dtype=jnp.float32).reshape(1, -1)   # (1, d_model)
    return w1_t, b1_row, w2_t, b2_row


def feed_forward(x, w1_t, b1_row, w2_t, b2_row, *, tm=None, tk=None):
    """x: (batch, seq, d_model).  Weights/biases already prepared by
    prepare_ffn_params (transposed to (in, out) layout, compute dtype)."""
    batch, seq, d_model = x.shape
    d_ff = w1_t.shape[1]
    assert w1_t.shape == (d_model, d_ff)
    assert w2_t.shape == (d_ff, d_model)
    M = batch * seq
    compute_dtype = w1_t.dtype
    cbytes = jnp.dtype(compute_dtype).itemsize
    sub = 8 * (4 // cbytes)  # sublane multiple: 8 for f32, 16 for bf16

    # Lane-dense feature dims (unmasked vst, full vreg lanes).
    assert d_model % 128 == 0, "d_model must be a multiple of 128"
    assert d_ff % 128 == 0, "d_ff must be a multiple of 128"

    # Tile selection (large M tile; d_ff reduction chunk).
    if tm is None:
        tm = min(512, M)
    if tk is None:
        tk = min(1024, d_ff)
    assert M % tm == 0, "token count must be divisible by tm"
    assert d_ff % tk == 0, "d_ff must be divisible by tk"
    assert tm % sub == 0 and tk % 128 == 0

    x2d = x.reshape(M, d_model).astype(compute_dtype)
    out_dtype = x.dtype
    obytes = jnp.dtype(out_dtype).itemsize

    grid = (M // tm, d_ff // tk)  # (row tiles: parallel, d_ff chunks: reduction)

    # VMEM budget estimate (double-buffered tiles + f32 accumulator), explicit limit.
    est = (2 * tm * d_model * cbytes                      # x tiles
           + 2 * (d_model * tk + tk * d_model) * cbytes   # W1 / W2 chunks
           + 2 * (tk + d_model) * 4                       # bias rows
           + 2 * tm * d_model * obytes                    # output tiles
           + tm * d_model * 4)                            # f32 accumulator
    vmem_limit = int(min(max(2 * est, 32 * 1024 * 1024), 64 * 1024 * 1024))

    cost = pl.CostEstimate(
        flops=4 * M * d_model * d_ff,  # two GEMMs, 2*M*K*N each
        transcendentals=0,
        bytes_accessed=(x2d.size * cbytes + w1_t.size * cbytes + w2_t.size * cbytes
                        + b1_row.size * 4 + b2_row.size * 4 + M * d_model * obytes),
    )

    out2d = pl.pallas_call(
        ffn_kernel,
        out_shape=jax.ShapeDtypeStruct((M, d_model), out_dtype),
        grid_spec=pltpu.PrefetchScalarGridSpec(
            num_scalar_prefetch=0,
            grid=grid,
            in_specs=[
                pl.BlockSpec((tm, d_model), lambda i, k: (i, 0)),   # x row tile
                pl.BlockSpec((d_model, tk), lambda i, k: (0, k)),   # W1^T chunk
                pl.BlockSpec((1, tk), lambda i, k: (0, k)),         # b1 chunk
                pl.BlockSpec((tk, d_model), lambda i, k: (k, 0)),   # W2^T chunk
                pl.BlockSpec((1, d_model), lambda i, k: (0, 0)),    # b2
            ],
            out_specs=pl.BlockSpec((tm, d_model), lambda i, k: (i, 0)),
            scratch_shapes=[pltpu.VMEM((tm, d_model), jnp.float32)],
        ),
        compiler_params=pltpu.CompilerParams(
            dimension_semantics=("parallel", "arbitrary"),
            vmem_limit_bytes=vmem_limit,
        ),
        cost_estimate=cost,
    )(x2d, w1_t, b1_row, w2_t, b2_row)
    return out2d.reshape(batch, seq, d_model)


def reference_ffn(x, w1, b1, w2, b2, compute_dtype=jnp.bfloat16):
    # Same numerics as the kernel: bf16 MXU operands, f32 accumulation/elementwise.
    xc = x.astype(compute_dtype)
    h = jnp.dot(xc, w1.T.astype(compute_dtype),
                preferred_element_type=jnp.float32) + b1.astype(jnp.float32)
    h = jnp.maximum(h, 0.0)
    out = jnp.dot(h.astype(compute_dtype), w2.T.astype(compute_dtype),
                  preferred_element_type=jnp.float32) + b2.astype(jnp.float32)
    return out.astype(x.dtype)


if __name__ == "__main__":
    # Small but lane-aligned shapes (multiples of 128 on feature dims).
    batch, seq, d_model, d_ff = 2, 128, 128, 256

    key = jax.random.PRNGKey(0)
    kx, kw1, kb1, kw2, kb2 = jax.random.split(key, 5)

    x = jax.random.normal(kx, (batch, seq, d_model), dtype=jnp.float32)
    # PyTorch nn.Linear parameter shapes: (out_features, in_features)
    w1 = jax.random.normal(kw1, (d_ff, d_model), dtype=jnp.float32) * 0.1
    b1 = jax.random.normal(kb1, (d_ff,), dtype=jnp.float32) * 0.1
    w2 = jax.random.normal(kw2, (d_model, d_ff), dtype=jnp.float32) * 0.1
    b2 = jax.random.normal(kb2, (d_model,), dtype=jnp.float32) * 0.1

    # One-time param preparation (transpose + bf16 cast) outside the hot path.
    params = prepare_ffn_params(w1, b1, w2, b2, compute_dtype=jnp.bfloat16)

    # tm=128, tk=128 -> grid (2, 2): exercises both the parallel row axis and
    # the d_ff reduction/accumulation path at these small demo shapes.
    out = feed_forward(x, *params, tm=128, tk=128)
    out = jax.block_until_ready(out)

    ref = reference_ffn(x, w1, b1, w2, b2, compute_dtype=jnp.bfloat16)
    assert out.shape == (batch, seq, d_model)
    max_err = float(jnp.max(jnp.abs(out - ref)))
    assert max_err < 5e-3, f"mismatch vs reference: max abs err {max_err}"

    print("KERNEL_OK")
</pallas_src>

<mosaic_0001>
module attributes {stable_mosaic.version = 11 : i64} {
  func.func @ffn_kernel(%arg0: i32, %arg1: i32, %arg2: memref<128x128xbf16, #tpu.memory_space<vmem>>, %arg3: memref<128x128xbf16, #tpu.memory_space<vmem>>, %arg4: memref<1x128xf32, #tpu.memory_space<vmem>>, %arg5: memref<128x128xbf16, #tpu.memory_space<vmem>>, %arg6: memref<1x128xf32, #tpu.memory_space<vmem>>, %arg7: memref<128x128xf32, #tpu.memory_space<vmem>>, %arg8: memref<128x128xf32, #tpu.memory_space<vmem>>) attributes {dimension_semantics = [#tpu.dimension_semantics<parallel>, #tpu.dimension_semantics<arbitrary>], iteration_bounds = array<i64: 2, 2>, scalar_prefetch = 0 : i64, scratch_operands = 1 : i64, tpu.core_type = #tpu.core_type<tc>, window_params = [{transform_indices = @transform_0, window_bounds = array<i64: 128, 128>}, {transform_indices = @transform_1, window_bounds = array<i64: 128, 128>}, {transform_indices = @transform_2, window_bounds = array<i64: 1, 128>}, {transform_indices = @transform_3, window_bounds = array<i64: 128, 128>}, {pipeline_mode = #tpu.pipeline_mode<synchronous>, transform_indices = @transform_4, window_bounds = array<i64: 1, 128>}, {transform_indices = @transform_5, window_bounds = array<i64: 128, 128>}]} {
    %c0_i32 = arith.constant 0 : i32
    %0 = arith.cmpi eq, %arg1, %c0_i32 : i32
    %1 = arith.extui %0 : i1 to i32
    %c0_i32_0 = arith.constant 0 : i32
    %2 = arith.cmpi ne, %1, %c0_i32_0 : i32
    scf.if %2 {
      %cst_15 = arith.constant 0.000000e+00 : f32
      %20 = vector.broadcast %cst_15 : f32 to vector<128x128xf32>
      %c0_16 = arith.constant 0 : index
      %c0_17 = arith.constant 0 : index
      %21 = vector.load %arg8[%c0_16, %c0_17] : memref<128x128xf32, #tpu.memory_space<vmem>>, vector<128x128xf32>
      tpu.vector_store %arg8[%c0_16, %c0_17], %20 {strides = array<i32>} : memref<128x128xf32, #tpu.memory_space<vmem>>, vector<128x128xf32>,
    } else {
    }
    %c0 = arith.constant 0 : index
    %c0_1 = arith.constant 0 : index
    %3 = vector.load %arg2[%c0, %c0_1] : memref<128x128xbf16, #tpu.memory_space<vmem>>, vector<128x128xbf16>
    %c0_2 = arith.constant 0 : index
    %c0_3 = arith.constant 0 : index
    %4 = vector.load %arg3[%c0_2, %c0_3] : memref<128x128xbf16, #tpu.memory_space<vmem>>, vector<128x128xbf16>
    %cst = arith.constant dense<0.000000e+00> : vector<128x128xf32>
    %5 = tpu.matmul %3, %4, %cst {dimension_numbers = #tpu.dot_dimension_numbers<[1], [0], [0], [1], [0, 0, 1, 1], [], []>} : vector<128x128xbf16>, vector<128x128xbf16>, vector<128x128xf32> -> vector<128x128xf32>
    %c0_4 = arith.constant 0 : index
    %c0_5 = arith.constant 0 : index
    %6 = vector.load %arg4[%c0_4, %c0_5] : memref<1x128xf32, #tpu.memory_space<vmem>>, vector<1x128xf32>
    %7 = vector.broadcast %6 : vector<1x128xf32> to vector<128x128xf32>
    %8 = arith.addf %5, %7 : vector<128x128xf32>
    %cst_6 = arith.constant 0.000000e+00 : f32
    %9 = vector.broadcast %cst_6 : f32 to vector<128x128xf32>
    %10 = arith.maximumf %8, %9 : vector<128x128xf32>
    %c0_7 = arith.constant 0 : index
    %c0_8 = arith.constant 0 : index
    %11 = vector.load %arg8[%c0_7, %c0_8] : memref<128x128xf32, #tpu.memory_space<vmem>>, vector<128x128xf32>
    %12 = arith.truncf %10 : vector<128x128xf32> to vector<128x128xbf16>
    %c0_9 = arith.constant 0 : index
    %c0_10 = arith.constant 0 : index
    %13 = vector.load %arg5[%c0_9, %c0_10] : memref<128x128xbf16, #tpu.memory_space<vmem>>, vector<128x128xbf16>
    %cst_11 = arith.constant dense<0.000000e+00> : vector<128x128xf32>
    %14 = tpu.matmul %12, %13, %cst_11 {dimension_numbers = #tpu.dot_dimension_numbers<[1], [0], [0], [1], [0, 0, 1, 1], [], []>} : vector<128x128xbf16>, vector<128x128xbf16>, vector<128x128xf32> -> vector<128x128xf32>
    %15 = arith.addf %11, %14 : vector<128x128xf32>
    %c0_12 = arith.constant 0 : index
    %c0_13 = arith.constant 0 : index
    %16 = vector.load %arg8[%c0_12, %c0_13] : memref<128x128xf32, #tpu.memory_space<vmem>>, vector<128x128xf32>
    tpu.vector_store %arg8[%c0_12, %c0_13], %15 {strides = array<i32>} : memref<128x128xf32, #tpu.memory_space<vmem>>, vector<128x128xf32>,
    %c1_i32 = arith.constant 1 : i32
    %17 = arith.cmpi eq, %arg1, %c1_i32 : i32
    %18 = arith.extui %17 : i1 to i32
    %c0_i32_14 = arith.constant 0 : i32
    %19 = arith.cmpi ne, %18, %c0_i32_14 : i32
    scf.if %19 {
      %c0_15 = arith.constant 0 : index
      %c0_16 = arith.constant 0 : index
      %20 = vector.load %arg8[%c0_15, %c0_16] : memref<128x128xf32, #tpu.memory_space<vmem>>, vector<128x128xf32>
      %c0_17 = arith.constant 0 : index
      %c0_18 = arith.constant 0 : index
      %21 = vector.load %arg6[%c0_17, %c0_18] : memref<1x128xf32, #tpu.memory_space<vmem>>, vector<1x128xf32>
      %22 = vector.broadcast %21 : vector<1x128xf32> to vector<128x128xf32>
      %23 = arith.addf %20, %22 : vector<128x128xf32>
      %c0_19 = arith.constant 0 : index
      %c0_20 = arith.constant 0 : index
      %24 = vector.load %arg7[%c0_19, %c0_20] : memref<128x128xf32, #tpu.memory_space<vmem>>, vector<128x128xf32>
      tpu.vector_store %arg7[%c0_19, %c0_20], %23 {strides = array<i32>} : memref<128x128xf32, #tpu.memory_space<vmem>>, vector<128x128xf32>,
    } else {
    }
    return
  }
  func.func @transform_0(%arg0: i32, %arg1: i32) -> (i32, i32) {
    %c0_i32 = arith.constant 0 : i32
    %c0_i32_0 = arith.constant 0 : i32
    return %arg0, %c0_i32 : i32, i32
  }
  func.func @transform_1(%arg0: i32, %arg1: i32) -> (i32, i32) {
    %c0_i32 = arith.constant 0 : i32
    %c0_i32_0 = arith.constant 0 : i32
    return %c0_i32, %arg1 : i32, i32
  }
  func.func @transform_2(%arg0: i32, %arg1: i32) -> (i32, i32) {
    %c0_i32 = arith.constant 0 : i32
    %c0_i32_0 = arith.constant 0 : i32
    return %c0_i32, %arg1 : i32, i32
  }
  func.func @transform_3(%arg0: i32, %arg1: i32) -> (i32, i32) {
    %c0_i32 = arith.constant 0 : i32
    %c0_i32_0 = arith.constant 0 : i32
    return %arg1, %c0_i32 : i32, i32
  }
  func.func @transform_4(%arg0: i32, %arg1: i32) -> (i32, i32) {
    %c0_i32 = arith.constant 0 : i32
    %c0_i32_0 = arith.constant 0 : i32
    %c0_i32_1 = arith.constant 0 : i32
    return %c0_i32, %c0_i32_0 : i32, i32
  }
  func.func @transform_5(%arg0: i32, %arg1: i32) -> (i32, i32) {
    %c0_i32 = arith.constant 0 : i32
    %c0_i32_0 = arith.constant 0 : i32
    return %arg0, %c0_i32 : i32, i32
  }
}

</mosaic_0001>

<bundles_post_ra>
// kernel: tpu_custom_call.1
= control target key start
LH: loop header
LB: loop body
LE: loop exit
PB: predicated region body
PF: predicated region fallthrough
CT: control target
= control target key end

     0   :  { %s2018_s0 = inlined_call_operand.hbm [shape: bf16[256,128], index: 0, kind: input, shape index: {}]   ;;  %s2019_s1 = inlined_call_operand.hbm [shape: bf16[128,256], index: 1, kind: input, shape index: {}]   ;;  %s2020_s2 = inlined_call_operand.vmem [shape: f32[1,256], index: 2, kind: input, shape index: {}]   ;;  %s2021_s3 = inlined_call_operand.hbm [shape: bf16[256,128], index: 3, kind: input, shape index: {}]   ;;  %s2022_s4 = inlined_call_operand.vmem [shape: f32[1,128], index: 4, kind: input, shape index: {}]   ;;  %s2023_s5 = inlined_call_operand.hbm [shape: f32[256,128], index: 5, kind: output, shape index: {}]  }
   0x1   :  { %2040 = sst [smem:[#allocation21_spill]] %s2019_s1 }
   0x2   :  { %2041 = sst [smem:[#allocation22_spill]] %s2022_s4 }
   0x3   :  { %2042 = sst [smem:[#allocation23_spill]] %s2023_s5 }
   0x4   :  { %10 = vsyncpa [#allocation4], 0 }
   0x5   :  { %12 = vsyncpa [#allocation4 + $0x1], 0 }
   0x6   :  { %13 = vsyncpa [#allocation7], 0 }
   0x7   :  { %15 = vsyncpa [#allocation7 + $0x1], 0 }
   0x8   :  { %16 = vsyncpa [#allocation5], 0 }
   0x9   :  { %18 = vsyncpa [#allocation5 + $0x1], 0  ;;  %s1592_s18 = smov 0   ;;  %s1594_s19 = smov 0  }
   0xa   :  { %s1596_s20 = smov 0   ;;  %s1598_s21 = smov 0  }
   0xb   :  { %s1600_s22 = smov 0   ;;  %s1602_s23 = smov 0  }
   0xc   :  { %s1604_s24 = smov 0   ;;  %s1606_s25 = smov 0  }
   0xd   :  { %s1608_s26 = smov 0   ;;  %s1610_s27 = smov 0  }
   0xe   :  { %s1612_s28 = smov 0  }
   0xf LB: > { %2043 = sst [smem:[#allocation13_spill]] %s1518_s20  ;;  %s33_s29 = sadd.s32 1, %s1542_s26  ;;  %s1550_s28 = sphi %s1612_s28, %s24_s28   ;;  %s1546_s27 = sphi %s1610_s27, %s2083_s27   ;;  %s1542_s26 = sphi %s1608_s26, %s2089_s26   ;;  %s1538_s25 = sphi %s1606_s25, %s2081_s25   ;;  %s1534_s24 = sphi %s1604_s24, %s2088_s24   ;;  %s1530_s23 = sphi %s1602_s23, %s2080_s23   ;;  %s1526_s22 = sphi %s1600_s22, %s2087_s22   ;;  %s1522_s21 = sphi %s1598_s21, %s2086_s21   ;;  %s1518_s20 = sphi %s1596_s20, %s2078_s20   ;;  %s1514_s19 = sphi %s1594_s19, %s2085_s19   ;;  %s1510_s18 = sphi %s1592_s18, %s2084_s18  }
  0x10   : > { %2044 = sst [smem:[#allocation14_spill]] %s1530_s23  ;;  %p2026_p0 = scmp.eq.s32.totalorder %s1550_s28, 0 }
  0x11   : > { %2045 = sst [smem:[#allocation15_spill]] %s1538_s25  ;;  %p1649_p1 = scmp.ge.s32.totalorder %s33_s29, 2 }
  0x12   : > { %2046 = sst [smem:[#allocation16_spill]] %s1546_s27  ;;  %s69_s6 = sadd.s32 1, %s1518_s20 }
  0x13   : > { %p76_p2 = scmp.ne.s32.totalorder %s1518_s20, %s1514_s19  ;;  %s2091_s29 = smov (%p1649_p1, %s33_s29), 0 }
  0x14   : > { %2048 = sst [smem:[#allocation17_spill]] %s2091_s29  ;;  %s66_s7 = ssub.s32 %s1542_s26, %s2091_s29 }
  0x15   : > { %p78_p4 = por %p76_p2, %p2026_p0  ;;  %p2025_p5 = scmp.lt.s32.totalorder %s1550_s28, 4 }
  0x16   : > { %p67_p6 = scmp.eq.s32.totalorder %s66_s7, 0  ;;  %s229_s8 = sand.u32 1, %s1550_s28  }
  0x17   : > { %s231_s10 = sand.u32 1, %s1518_s20   ;;  %s1051_s12 = sshll.u32 %s1542_s26, 6 }
  0x18   : > { %s1669_s9 = scalar_select %p67_p6, %s1518_s20, %s69_s6  }
  0x19   : > { %s1672_s11 = sshll.u32 %s231_s10, 6  ;;  %s2050_s1 = sld [smem:[#allocation21_spill]] }
  0x1a   : > { %2049 = sst [smem:[#allocation18_spill]] %s1669_s9  ;;  %s233_s16 = scalar_lea.vmem [#allocation6], %s1672_s11 }
  0x1b   : > { %s239_s17 = sshll.u32 %s233_s16, 4  ;;  %p1683_p7 = pnand %p2025_p5, %p78_p4  ;;  %s1687_s17 = int_to_ptr.vmem [resolvable:$true] %s239_s17 }
  0x1c   : > { %s1690_s7 = scalar_lea.sflag [#allocation7], %s229_s8 }
  0x1d   : > { %p2029_p10 = pneg %p1683_p7 }
  0x1f   : > { %s1678_s15 = scalar_lea.hbm %s2050_s1, %s1051_s12  ;;  %s1339_s14 = scalar_lea.hbm %s2050_s1, 2048 }
  0x20   : > { %s1334_s10 = scalar_lea.hbm %s1678_s15, 1024  ;;  %p1340_p13 = scmp.lt.u32.totalorder %s1678_s15, %s2050_s1 }
  0x21   : > { %p1335_p9 = scmp.ne.s32.totalorder %s1678_s15, %s1334_s10  ;;  %p1341_p2 = scmp.lt.u32.totalorder %s1339_s14, %s1334_s10 }
  0x22   : > { %p1343_p6 = scmp.lt.u32.totalorder %s1334_s10, %s1678_s15 }
  0x23   : > { %p1337_p11 = pnand %p2029_p10, %p1335_p9  ;;  %p1342_p4 = por %p1341_p2, %p1340_p13 }
  0x25   : > { %p1338_p12 = pneg %p1337_p11  ;;  %p1344_p5 = por %p1343_p6, %p1342_p4 }
  0x27   : > { %p1345_p3 = pnand %p1344_p5, %p1338_p12 }
  0x29   : > { %1348 = shalt.err (!%p1345_p3)
}
  0x2a   : > { %s1349_s8 = scalar_lea.vmem %s1687_s17, 1024  ;;  %s1552_s12 = smov [#allocation6]  }
  0x2b   : > { %p1350_p9 = scmp.ne.s32.totalorder %s1687_s17, %s1349_s8  ;;  %s1354_s13 = sshll.u32 %s1552_s12, 4  ;;  %s1355_s13 = int_to_ptr.vmem [resolvable:$false] %s1354_s13 }
  0x2c   : > { %s1356_s29 = scalar_lea.vmem %s1355_s13, 2048  ;;  %p1357_p8 = scmp.lt.s32.totalorder %s1687_s17, %s1355_s13 }
  0x2d   : > { %p1352_p11 = pnand %p1350_p9, %p2029_p10  ;;  %p1358_p13 = scmp.lt.s32.totalorder %s1356_s29, %s1349_s8 }
  0x2f   : > { %p1353_p0 = pneg %p1352_p11  ;;  %p1359_p2 = por %p1358_p13, %p1357_p8 }
  0x31   : > { %p1360_p4 = pnand %p1359_p2, %p1353_p0 }
  0x33   : > { %1363 = shalt.err (!%p1360_p4)
}
  0x34   : > { %s1553_s10 = smov 128   ;;  %s2027_s14 = smov 64  }
  0x35   : > { %s2030_s16 = smov 4   ;;  %p274_p0 = scmp.lt.s32.totalorder %s1550_s28, 5 }
  0x36   : > { %1206 = dma.hbm_to_vmem [thread:$0]  (!%p1683_p7), %s1678_s15, 1024, %s1687_s17, %s1690_s7, %s1553_s10, %s2027_s14, %s2030_s16  }
  0x37   : > { %p2052_p3 = scmp.ge.s32.totalorder %s1550_s28, 1  ;;  %s1728_s12 = sadd.s32 4294967295, %s1550_s28  }
  0x38   : > { %s1044_s13 = sadd.s32 4294967294, %s1550_s28   ;;  %s36_s29 = sadd.s32 1, %s1546_s27 }
  0x39   : > { %p1723_p5 = pnand %p2052_p3, %p274_p0  ;;  %s43_s1 = sadd.s32 1, %s1530_s23 }
  0x3a   : > { %s2093_s29 = smov (!%p1649_p1, %s36_s29), %s1546_s27  ;;  %p50_p8 = scmp.ne.s32.totalorder %s1530_s23, %s1526_s22 }
  0x3b   : > { %s2053_s8 = scalar_select %p1723_p5, 1, 0 }
  0x3c   : > { %p56_p12 = scmp.ne.s32.totalorder %s1526_s22, %s1522_s21  ;;  %p38_p6 = scmp.ge.s32.totalorder %s2093_s29, 2 }
  0x3d   : > { %p57_p9 = scmp.eq.s32.totalorder %s1728_s12, 0  ;;  %p2054_p11 = scmp.eq.s32.totalorder %s1550_s28, 0 }
  0x3e   : > { %p179_p2 = scmp.eq.s32.totalorder %s1728_s12, 3  ;;  %s2095_s29 = smov (%p38_p6, %s2093_s29), 0 }
  0x3f   : > { %p1743_p13 = por %p2054_p11, %p50_p8  ;;  %2056 = sst [smem:[#allocation19_spill]] %s2095_s29 }
  0x40   : > { %p1753_p1 = por %p57_p9, %p56_p12  ;;  %p2058_p4 = scmp.ne.s32.totalorder %s1514_s19, %s1510_s18 }
  0x41   : > { %s40_s10 = ssub.s32 %s1546_s27, %s2095_s29  ;;  %p1766_p3 = por %p179_p2, %p50_p8 }
  0x42   : > { %s2057_s30 = scalar_select %p1753_p1, 1, 0 }
  0x43   : > { %p1760_p0 = por %p2058_p4, %p57_p9  ;;  %p41_p11 = scmp.eq.s32.totalorder %s40_s10, 0 }
  0x44   : > { %s2060_s14 = scalar_select %p1766_p3, 1, 0 }
  0x45   : > { %s2059_s17 = scalar_select %p1760_p0, 1, 0 }
  0x46   : > { %p185_p10 = scmp.eq.s32.totalorder %s1044_s13, 3  ;;  %s208_s16 = sand.u32 1, %s1530_s23  }
  0x47   : > { %s1093_s9 = sshll.u32 %s1546_s27, 10  ;;  %s1047_s18 = sshll.u32 %s208_s16, 6 }
  0x48   : > { %s1773_s20 = scalar_select %p41_p11, %s1530_s23, %s43_s1  }
  0x49   : > { %p1778_p6 = por %p185_p10, %p56_p12  ;;  %s1785_s29 = scalar_lea.hbm %s2018_s0, %s1093_s9 }
  0x4a   : > { %2061 = sst [smem:[#allocation20_spill]] %s1773_s20  ;;  %p2063_p8 = scmp.lt.s32.totalorder %s1550_s28, 4 }
  0x4b   : > { %s2062_s5 = scalar_select %p1778_p6, 1, 0 }
  0x4c   : > { %p1791_p9 = pnand %p2063_p8, %p1743_p13  ;;  %s212_s13 = scalar_lea.vmem [#allocation3], %s1047_s18 }
  0x4d   : > { %s219_s10 = sshll.u32 %s212_s13, 4  ;;  %s1797_s27 = scalar_lea.sflag [#allocation4], %s208_s16  ;;  %s1795_s10 = int_to_ptr.vmem [resolvable:$true] %s219_s10 }
  0x4e   : > { %s1364_s4 = scalar_lea.hbm %s1785_s29, 1024  ;;  %p1366_p12 = pneg %p1791_p9 }
  0x4f   : > { %p1365_p10 = scmp.ne.s32.totalorder %s1785_s29, %s1364_s4  ;;  %s1369_s15 = scalar_lea.hbm %s2018_s0, 2048 }
  0x50   : > { %p1370_p13 = scmp.lt.u32.totalorder %s1785_s29, %s2018_s0  ;;  %p1371_p11 = scmp.lt.u32.totalorder %s1369_s15, %s1364_s4 }
  0x51   : > { %p1367_p2 = pnand %p1366_p12, %p1365_p10  ;;  %p1373_p6 = scmp.lt.u32.totalorder %s1364_s4, %s1785_s29 }
  0x52   : > { %p1372_p8 = por %p1371_p11, %p1370_p13 }
  0x53   : > { %p1368_p4 = pneg %p1367_p2 }
  0x54   : > { %p1374_p3 = por %p1373_p6, %p1372_p8 }
  0x56   : > { %p1375_p0 = pnand %p1374_p3, %p1368_p4 }
  0x58   : > { %1378 = shalt.err (!%p1375_p0)
}
  0x59   : > { %s1379_s16 = scalar_lea.vmem %s1795_s10, 1024  ;;  %s1556_s18 = smov [#allocation3]  }
  0x5a   : > { %p1380_p10 = scmp.ne.s32.totalorder %s1795_s10, %s1379_s16  ;;  %s1384_s13 = sshll.u32 %s1556_s18, 4  ;;  %s1385_s13 = int_to_ptr.vmem [resolvable:$false] %s1384_s13 }
  0x5b   : > { %s1386_s20 = scalar_lea.vmem %s1385_s13, 2048  ;;  %p1387_p5 = scmp.lt.s32.totalorder %s1795_s10, %s1385_s13 }
  0x5c   : > { %p1382_p2 = pnand %p1380_p10, %p1366_p12  ;;  %p1388_p13 = scmp.lt.s32.totalorder %s1386_s20, %s1379_s16 }
  0x5e   : > { %p1383_p1 = pneg %p1382_p2  ;;  %p1389_p11 = por %p1388_p13, %p1387_p5 }
  0x60   : > { %p1390_p6 = pnand %p1389_p11, %p1383_p1 }
  0x62   : > { %1393 = shalt.err (!%p1390_p6)
}
  0x63   : > { %s2065_s23 = smov 4   ;;  %s2066_s4 = smov 64  }
  0x64   : > { %1203 = dma.hbm_to_vmem [thread:$0]  (!%p1791_p9), %s1785_s29, 1024, %s1795_s10, %s1797_s27, %s2066_s4, %s2066_s4, %s2065_s23  }
  0x65   : > { %s1094_s25 = sshll.u32 %s1542_s26, 10  ;;  %s259_s9 = scalar_lea.vmem [#allocation8], %s1672_s11 }
  0x66   : > { %s266_s15 = sshll.u32 %s259_s9, 4  ;;  %s1833_s13 = scalar_lea.hbm %s2021_s3, %s1094_s25  ;;  %s1835_s15 = int_to_ptr.vmem [resolvable:$true] %s266_s15 }
  0x67   : > { %s1394_s1 = scalar_lea.hbm %s1833_s13, 1024  ;;  %p2067_p1 = pneg %p1683_p7 }
  0x68   : > { %p1395_p5 = scmp.ne.s32.totalorder %s1833_s13, %s1394_s1  ;;  %s1399_s29 = scalar_lea.hbm %s2021_s3, 2048 }
  0x69   : > { %p1400_p9 = scmp.lt.u32.totalorder %s1833_s13, %s2021_s3  ;;  %p1401_p12 = scmp.lt.u32.totalorder %s1399_s29, %s1394_s1 }
  0x6a   : > { %p1397_p0 = pnand %p1395_p5, %p2067_p1  ;;  %p1403_p8 = scmp.lt.u32.totalorder %s1394_s1, %s1833_s13 }
  0x6b   : > { %p1402_p4 = por %p1401_p12, %p1400_p9 }
  0x6c   : > { %p1398_p3 = pneg %p1397_p0 }
  0x6d   : > { %p1404_p10 = por %p1403_p8, %p1402_p4 }
  0x6f   : > { %p1405_p2 = pnand %p1404_p10, %p1398_p3 }
  0x71   : > { %1408 = shalt.err (!%p1405_p2)
}
  0x72   : > { %s1409_s25 = scalar_lea.vmem %s1835_s15, 1024  ;;  %p2068_p11 = pmov %p2067_p1 }
  0x73   : > { %p1410_p13 = scmp.ne.s32.totalorder %s1835_s15, %s1409_s25  ;;  %s1557_s9 = smov [#allocation8]  }
  0x74   : > { %s1414_s18 = sshll.u32 %s1557_s9, 4  ;;  %s1415_s18 = int_to_ptr.vmem [resolvable:$false] %s1414_s18 }
  0x75   : > { %p1412_p6 = pnand %p1410_p13, %p2068_p11  ;;  %s1416_s16 = scalar_lea.vmem %s1415_s18, 2048 }
  0x76   : > { %p1417_p1 = scmp.lt.s32.totalorder %s1835_s15, %s1415_s18  ;;  %p1418_p0 = scmp.lt.s32.totalorder %s1416_s16, %s1409_s25 }
  0x77   : > { %p1413_p5 = pneg %p1412_p6 }
  0x78   : > { %p1419_p9 = por %p1418_p0, %p1417_p1 }
  0x7a   : > { %p1420_p12 = pnand %p1419_p9, %p1413_p5 }
  0x7c   : > { %1423 = shalt.err (!%p1420_p12)
}
  0x7d   : > { %1209 = dma.hbm_to_vmem [thread:$0]  (!%p1683_p7), %s1833_s13, 1024, %s1835_s15, %s1690_s7, %s2066_s4, %s2066_s4, %s2065_s23  }
  0x7e   : > { %p2069_p3 = scmp.ne.s32.totalorder %s2053_s8, 0 }
  0x7f   : > { %s1867_s1 = sand.u32 (!%p2069_p3), 1, %s1526_s22   ;;  %p2070_p4 = scmp.ne.s32.totalorder (!%p2069_p3), %s2057_s30, 0 }
  0x80   : > { %278 = sbr.rel (%p2069_p3) target bundleno = 689 (0x2b1), region = 40  ;;  %s1056_s27 = sshll.u32 (!%p2069_p3), %s1867_s1, 6 }
  0x81   : > { %s281_s11 = scalar_lea.sflag (!%p2069_p3), [#allocation4], %s1867_s1  ;;  %s1871_s29 = scalar_lea.vmem (!%p2069_p3), [#allocation3], %s1056_s27 }
  0x87   : > { %1497 = dma.done.wait (%p2070_p4), %s281_s11, 1024  }
  0x88   : > { %1499 = vsyncadd (%p2070_p4), %s281_s11, 4294966272  ;;  %s289_s6 = sand.u32 1, %s1728_s12   ;;  %s291_s7 = sand.u32 1, %s1514_s19  }
  0x89   : > { %s1057_s8 = sshll.u32 %s291_s7, 6  ;;  %s290_s23 = scalar_lea.sflag [#allocation7], %s289_s6 }
  0x8a   : > { %s1879_s4 = scalar_lea.vmem [#allocation6], %s1057_s8  ;;  %p2071_p7 = scmp.ne.s32.totalorder %s2059_s17, 0 }
  0x8c   : > { %1501 = dma.done.wait (%p2071_p7), %s290_s23, 2048  }
  0x8d   : > { %1503 = vsyncadd (%p2071_p7), %s290_s23, 4294965248  ;;  %s1059_s15 = sshll.u32 %s1867_s1, 7  ;;  %p343_p8 = scmp.lt.s32.totalorder %s1534_s24, 1 }
  0x8e   : > { %s1894_s20 = scalar_lea.vmem [#allocation8], %s1057_s8  ;;  %s1896_s25 = scalar_lea.vmem [#allocation9], %s1059_s15 }
  0x8f   : > { %s1888_s30 = scalar_select %p343_p8, %s1534_s24, 1 }
  0x90   : > { %p1060_p10 = scmp.ne.s32.totalorder %s1534_s24, 0 }
  0x91   : > { %s345_s10 = scalar_lea.vmem %s2020_s2, %s1888_s30  ;;  %v1558_v0 = vmov (!%p1060_p10), 0.0  }
  0x92   : > { %352 = sbr.rel (%p1060_p10) target bundleno = 154 (0x9a), region = 56  ;;  %353 = vst [vmem:[#allocation2] sm:$0xff] (!%p1060_p10), %v1558_v0  ;;  %354 = vst [vmem:[#allocation2 + $0x8] sm:$0xff] (!%p1060_p10), %v1558_v0 }
  0x93   : > { %355 = vst [vmem:[#allocation2 + $0x10] sm:$0xff] (!%p1060_p10), %v1558_v0  ;;  %356 = vst [vmem:[#allocation2 + $0x18] sm:$0xff] (!%p1060_p10), %v1558_v0 }
  0x94   : > { %357 = vst [vmem:[#allocation2 + $0x20] sm:$0xff] (!%p1060_p10), %v1558_v0  ;;  %358 = vst [vmem:[#allocation2 + $0x28] sm:$0xff] (!%p1060_p10), %v1558_v0 }
  0x95   : > { %359 = vst [vmem:[#allocation2 + $0x30] sm:$0xff] (!%p1060_p10), %v1558_v0  ;;  %360 = vst [vmem:[#allocation2 + $0x38] sm:$0xff] (!%p1060_p10), %v1558_v0 }
  0x96   : > { %361 = vst [vmem:[#allocation2 + $0x40] sm:$0xff] (!%p1060_p10), %v1558_v0  ;;  %362 = vst [vmem:[#allocation2 + $0x48] sm:$0xff] (!%p1060_p10), %v1558_v0 }
  0x97   : > { %363 = vst [vmem:[#allocation2 + $0x50] sm:$0xff] (!%p1060_p10), %v1558_v0  ;;  %364 = vst [vmem:[#allocation2 + $0x58] sm:$0xff] (!%p1060_p10), %v1558_v0 }
  0x98   : > { %365 = vst [vmem:[#allocation2 + $0x60] sm:$0xff] (!%p1060_p10), %v1558_v0  ;;  %366 = vst [vmem:[#allocation2 + $0x68] sm:$0xff] (!%p1060_p10), %v1558_v0 }
  0x99   : > { %367 = vst [vmem:[#allocation2 + $0x70] sm:$0xff] %v1558_v0  ;;  %368 = vst [vmem:[#allocation2 + $0x78] sm:$0xff] %v1558_v0 }
  0x9a PF: > { %v1310_v1 = vld [vmem:[%s1879_s4] sm:$0xff]   ;;  %v1311_v2 = vld [vmem:[%s1879_s4 + $0x8] sm:$0xff]   ;;  %v1312_v3 = vld [vmem:[%s1879_s4 + $0x10] sm:$0xff]   ;;  %p1086_p2 = scmp.ne.s32.totalorder %s1534_s24, 1 }
  0x9b   : > { %1128 = vmatprep.subr.bf16.mxu0 %v1310_v1  ;;  %v1313_v4 = vld [vmem:[%s1879_s4 + $0x18] sm:$0xff]   ;;  %v1318_v5 = vld [vmem:[%s1871_s29] sm:$0xff]   ;;  %v1315_v7 = vld [vmem:[%s1879_s4 + $0x28] sm:$0xff]   ;;  %s2072_s27 = sld [smem:[#allocation22_spill]] (!%p1086_p2) }
  0x9c   : > { %1129 = vmatpush3.bf16.msra.mxu0 %v1310_v1  ;;  %1144 = vmatprep.mubr.bf16.mxu0 %v1318_v5  ;;  %v1314_v6 = vld [vmem:[%s1879_s4 + $0x20] sm:$0xff]   ;;  %v1327_v9 = vld [vmem:[%s1894_s20 + $0x8] sm:$0xff]   ;;  %v1316_v10 = vld [vmem:[%s1879_s4 + $0x30] sm:$0xff]  }
  0x9d   : > { %1130 = vmatprep.subr.bf16.mxu0 %v1311_v2  ;;  %v1326_v8 = vld [vmem:[%s1894_s20] sm:$0xff]   ;;  %v1328_v11 = vld [vmem:[%s1894_s20 + $0x10] sm:$0xff]   ;;  %v1317_v12 = vld [vmem:[%s1879_s4 + $0x38] sm:$0xff]  }
  0x9e   : > { %1160 = vmatprep.subr.bf16.mxu1 %v1326_v8  ;;  %v1329_v13 = vld [vmem:[%s1894_s20 + $0x18] sm:$0xff]   ;;  %v1330_v14 = vld [vmem:[%s1894_s20 + $0x20] sm:$0xff]   ;;  %v1319_v15 = vld [vmem:[%s1871_s29 + $0x8] sm:$0xff]  }
  0x9f   : > { %1161 = vmatpush3.bf16.msra.mxu1 %v1326_v8  ;;  %v1320_v16 = vld [vmem:[%s1871_s29 + $0x10] sm:$0xff]   ;;  %v1331_v17 = vld [vmem:[%s1894_s20 + $0x28] sm:$0xff]   ;;  %v1321_v18 = vld [vmem:[%s1871_s29 + $0x18] sm:$0xff]  }
  0xa0   : > { %1131 = vmatpush3.bf16.msra.mxu0 %v1311_v2  ;;  %1162 = vmatprep.subr.bf16.mxu1 %v1327_v9  ;;  %v1322_v19 = vld [vmem:[%s1871_s29 + $0x20] sm:$0xff]   ;;  %v1323_v20 = vld [vmem:[%s1871_s29 + $0x28] sm:$0xff]   ;;  %v1324_v21 = vld [vmem:[%s1871_s29 + $0x30] sm:$0xff]  }
  0xa1   : > { %1132 = vmatprep.subr.bf16.mxu0 %v1312_v3  ;;  %v1325_v22 = vld [vmem:[%s1871_s29 + $0x38] sm:$0xff]   ;;  %v1332_v23 = vld [vmem:[%s1894_s20 + $0x30] sm:$0xff]   ;;  %v1061_v25 = vld [vmem:[%s345_s10] ss:$0 sm:$0xff] }
  0xa2   : > { %v1333_v24 = vld [vmem:[%s1894_s20 + $0x38] sm:$0xff]  }
  0xa3   : > { %1163 = vmatpush3.bf16.msra.mxu1 %v1327_v9 }
  0xa4   : > { %1133 = vmatpush3.bf16.msra.mxu0 %v1312_v3  ;;  %1164 = vmatprep.subr.bf16.mxu1 %v1328_v11 }
  0xa5   : > { %1134 = vmatprep.subr.bf16.mxu0 %v1313_v4 }
  0xa7   : > { %1165 = vmatpush3.bf16.msra.mxu1 %v1328_v11 }
  0xa8   : > { %1135 = vmatpush3.bf16.msra.mxu0 %v1313_v4  ;;  %1166 = vmatprep.subr.bf16.mxu1 %v1329_v13 }
  0xa9   : > { %1136 = vmatprep.subr.bf16.mxu0 %v1314_v6 }
  0xab   : > { %1167 = vmatpush3.bf16.msra.mxu1 %v1329_v13 }
  0xac   : > { %1137 = vmatpush3.bf16.msra.mxu0 %v1314_v6  ;;  %1168 = vmatprep.subr.bf16.mxu1 %v1330_v14 }
  0xad   : > { %1138 = vmatprep.subr.bf16.mxu0 %v1315_v7 }
  0xaf   : > { %1169 = vmatpush3.bf16.msra.mxu1 %v1330_v14 }
  0xb0   : > { %1139 = vmatpush3.bf16.msra.mxu0 %v1315_v7  ;;  %1170 = vmatprep.subr.bf16.mxu1 %v1331_v17 }
  0xb1   : > { %1140 = vmatprep.subr.bf16.mxu0 %v1316_v10 }
  0xb3   : > { %1171 = vmatpush3.bf16.msra.mxu1 %v1331_v17 }
  0xb4   : > { %1141 = vmatpush3.bf16.msra.mxu0 %v1316_v10  ;;  %1172 = vmatprep.subr.bf16.mxu1 %v1332_v23 }
  0xb5   : > { %1142 = vmatprep.subr.bf16.mxu0 %v1317_v12 }
  0xb7   : > { %1173 = vmatpush3.bf16.msra.mxu1 %v1332_v23 }
  0xb8   : > { %1143 = vmatpush3.bf16.msra.mxu0 %v1317_v12  ;;  %1174 = vmatprep.subr.bf16.mxu1 %v1333_v24 }
  0xbb   : > { %1145 = vmatmul.mubr.bf16.vlgmr.msra.gmra.mrb[0].mxu0 %v1319_v15  ;;  %1175 = vmatpush3.bf16.msra.mxu1 %v1333_v24  ;;  %v618_v24 = vld [vmem:[#allocation2 + $0x8] sm:$0xff] }
  0xbc   : > { %1148 = vmatprep.mubr.bf16.mxu0 %v1320_v16 }
  0xc3   : > { %1149 = vmatmul.mubr.bf16.gmra.mrb[4].mxu0 %v1321_v18  ;;  %v619_v18 = vld [vmem:[#allocation2 + $0x10] sm:$0xff] }
  0xc4   : > { %1152 = vmatprep.mubr.bf16.mxu0 %v1322_v19  ;;  %v617_v19 = vld [vmem:[#allocation2] sm:$0xff] }
  0xcb   : > { %1153 = vmatmul.mubr.bf16.gmra.mrb[8].mxu0 %v1323_v20 }
  0xcc   : > { %1156 = vmatprep.mubr.bf16.mxu0 %v1324_v21  ;;  %v620_v21 = vld [vmem:[#allocation2 + $0x18] sm:$0xff] }
  0xd3   : > { %1157 = vmatmul.mubr.bf16.gmra.mrb[12].mxu0 %v1325_v22 }
 0x18e   : > { %v1146_v26 = vpop.f32.mrb[0].mxu0 }
 0x18f   : > { %v547_v27 = vadd.f32 %v1146_v26, %v1061_v25  ;;  %v538_v28 = vpop.f32.mrb[1].mxu0 }
 0x190   : > { %v539_v29 = vadd.f32 %v1061_v25, %v538_v28  ;;  %v1147_v30 = vpop.f32.mrb[2].mxu0 }
 0x191   : > { %v550_v31 = vadd.f32 %v1147_v30, %v1061_v25  ;;  %v541_v32 = vpop.f32.mrb[3].mxu0  ;;  %v603_v34 = vmax.f32 %v547_v27, 0.0  ;;  %v623_v30 = vld [vmem:[#allocation2 + $0x30] sm:$0xff] }
 0x192   : > { %v542_v33 = vadd.f32 %v1061_v25, %v541_v32  ;;  %v601_v36 = vmax.f32 %v539_v29, 0.0 }
 0x193   : > { %v604_v35 = vmax.f32 %v550_v31, 0.0  ;;  %v621_v31 = vld [vmem:[#allocation2 + $0x20] sm:$0xff] }
 0x194   : > { %v602_v37 = vmax.f32 %v542_v33, 0.0  ;;  %v624_v33 = vld [vmem:[#allocation2 + $0x38] sm:$0xff] }
 0x195   : > { %v634_v38 = vpack.c.bf16 %v604_v35, %v603_v34 }
 0x196   : > { %v1150_v39 = vpop.f32.mrb[4].mxu0  ;;  %v633_v40 = vpack.c.bf16 %v602_v37, %v601_v36  ;;  %v622_v36 = vld [vmem:[#allocation2 + $0x28] sm:$0xff] }
 0x197   : > { %v563_v41 = vadd.f32 %v1150_v39, %v1061_v25  ;;  %v554_v42 = vpop.f32.mrb[5].mxu0 }
 0x198   : > { %v555_v43 = vadd.f32 %v1061_v25, %v554_v42  ;;  %v1151_v44 = vpop.f32.mrb[6].mxu0  ;;  %1176 = vmatprep.mubr.bf16.mxu1 %v633_v40  ;;  %v627_v42 = vld [vmem:[#allocation2 + $0x50] sm:$0xff] }
 0x199   : > { %v566_v45 = vadd.f32 %v1151_v44, %v1061_v25  ;;  %v557_v46 = vpop.f32.mrb[7].mxu0  ;;  %1177 = vmatmul.mubr.bf16.vlgmr.msra.gmra.mrb[0].mxu1 %v634_v38  ;;  %v607_v48 = vmax.f32 %v563_v41, 0.0 }
 0x19a   : > { %v558_v47 = vadd.f32 %v1061_v25, %v557_v46  ;;  %v605_v50 = vmax.f32 %v555_v43, 0.0  ;;  %v625_v43 = vld [vmem:[#allocation2 + $0x40] sm:$0xff] }
 0x19b   : > { %v608_v49 = vmax.f32 %v566_v45, 0.0  ;;  %v628_v45 = vld [vmem:[#allocation2 + $0x58] sm:$0xff] }
 0x19c   : > { %v606_v51 = vmax.f32 %v558_v47, 0.0 }
 0x19d   : > { %v636_v52 = vpack.c.bf16 %v608_v49, %v607_v48  ;;  %v626_v48 = vld [vmem:[#allocation2 + $0x48] sm:$0xff] }
 0x19e   : > { %v635_v53 = vpack.c.bf16 %v606_v51, %v605_v50  ;;  %v1154_v54 = vpop.f32.mrb[8].mxu0 }
 0x19f   : > { %v579_v55 = vadd.f32 %v1154_v54, %v1061_v25  ;;  %v570_v56 = vpop.f32.mrb[9].mxu0  ;;  %v631_v54 = vld [vmem:[#allocation2 + $0x70] sm:$0xff] }
 0x1a0   : > { %v571_v57 = vadd.f32 %v1061_v25, %v570_v56  ;;  %v1155_v58 = vpop.f32.mrb[10].mxu0  ;;  %1180 = vmatprep.mubr.bf16.mxu1 %v635_v53 }
 0x1a1   : > { %v582_v59 = vadd.f32 %v1155_v58, %v1061_v25  ;;  %v573_v60 = vpop.f32.mrb[11].mxu0  ;;  %1181 = vmatmul.mubr.bf16.gmra.mrb[4].mxu1 %v636_v52  ;;  %v611_v62 = vmax.f32 %v579_v55, 0.0  ;;  %v629_v55 = vld [vmem:[#allocation2 + $0x60] sm:$0xff] }
 0x1a2   : > { %v574_v61 = vadd.f32 %v1061_v25, %v573_v60  ;;  %v609_v0 = vmax.f32 %v571_v57, 0.0  ;;  %v632_v57 = vld [vmem:[#allocation2 + $0x78] sm:$0xff]  ;;  %v630_v60 = vld [vmem:[#allocation2 + $0x68] sm:$0xff] }
 0x1a3   : > { %v612_v63 = vmax.f32 %v582_v59, 0.0 }
 0x1a4   : > { %v610_v1 = vmax.f32 %v574_v61, 0.0 }
 0x1a5   : > { %v638_v2 = vpack.c.bf16 %v612_v63, %v611_v62 }
 0x1a6   : > { %v637_v3 = vpack.c.bf16 %v610_v1, %v609_v0  ;;  %v1158_v4 = vpop.f32.mrb[12].mxu0 }
 0x1a7   : > { %v595_v5 = vadd.f32 %v1158_v4, %v1061_v25  ;;  %v586_v6 = vpop.f32.mrb[13].mxu0 }
 0x1a8   : > { %v587_v7 = vadd.f32 %v1061_v25, %v586_v6  ;;  %v1159_v8 = vpop.f32.mrb[14].mxu0  ;;  %1184 = vmatprep.mubr.bf16.mxu1 %v637_v3  ;;  %v1087_v3 = vld [vmem:[%s2072_s27] ss:$0 sm:$0xff] (!%p1086_p2) }
 0x1a9   : > { %v598_v9 = vadd.f32 %v1159_v8, %v1061_v25  ;;  %v589_v10 = vpop.f32.mrb[15].mxu0  ;;  %1185 = vmatmul.mubr.bf16.gmra.mrb[8].mxu1 %v638_v2  ;;  %v615_v12 = vmax.f32 %v595_v5, 0.0 }
 0x1aa   : > { %v590_v11 = vadd.f32 %v1061_v25, %v589_v10  ;;  %v613_v14 = vmax.f32 %v587_v7, 0.0 }
 0x1ab   : > { %v616_v13 = vmax.f32 %v598_v9, 0.0 }
 0x1ac   : > { %v614_v15 = vmax.f32 %v590_v11, 0.0 }
 0x1ad   : > { %v640_v16 = vpack.c.bf16 %v616_v13, %v615_v12 }
 0x1ae   : > { %v639_v17 = vpack.c.bf16 %v614_v15, %v613_v14 }
 0x1b0   : > { %1188 = vmatprep.mubr.bf16.mxu1 %v639_v17 }
 0x1b1   : > { %1189 = vmatmul.mubr.bf16.gmra.mrb[12].mxu1 %v640_v16 }
 0x26c   : > { %v1178_v20 = vpop.f32.mrb[0].mxu1 }
 0x26d   : > { %v804_v22 = vadd.f32 %v1178_v20, %v619_v18  ;;  %v739_v23 = vpop.f32.mrb[1].mxu1 }
 0x26e   : > { %v802_v26 = vadd.f32 %v739_v23, %v617_v19  ;;  %v1179_v27 = vpop.f32.mrb[2].mxu1 }
 0x26f   : > { %820 = vst [vmem:[#allocation2 + $0x10] sm:$0xff] %v804_v22  ;;  %v805_v28 = vadd.f32 %v1179_v27, %v620_v21  ;;  %v742_v25 = vpop.f32.mrb[3].mxu1 }
 0x270   : > { %818 = vst [vmem:[#allocation2] sm:$0xff] %v802_v26  ;;  %v803_v29 = vadd.f32 %v742_v25, %v618_v24 }
 0x271   : > { %821 = vst [vmem:[#allocation2 + $0x18] sm:$0xff] %v805_v28 }
 0x272   : > { %819 = vst [vmem:[#allocation2 + $0x8] sm:$0xff] %v803_v29 }
 0x274   : > { %v1182_v32 = vpop.f32.mrb[4].mxu1 }
 0x275   : > { %v808_v34 = vadd.f32 %v1182_v32, %v623_v30  ;;  %v755_v35 = vpop.f32.mrb[5].mxu1 }
 0x276   : > { %v806_v37 = vadd.f32 %v755_v35, %v621_v31  ;;  %v1183_v38 = vpop.f32.mrb[6].mxu1  ;;  %v840_v7 = vld [vmem:[#allocation2 + $0x10] sm:$0xff] (!%p1086_p2) }
 0x277   : > { %824 = vst [vmem:[#allocation2 + $0x30] sm:$0xff] %v808_v34  ;;  %v809_v39 = vadd.f32 %v1183_v38, %v624_v33  ;;  %v758_v40 = vpop.f32.mrb[7].mxu1  ;;  %v838_v2 = vld [vmem:[#allocation2] sm:$0xff] (!%p1086_p2)  ;;  %v863_v10 = vadd.f32 (!%p1086_p2), %v1087_v3, %v840_v7 }
 0x278   : > { %822 = vst [vmem:[#allocation2 + $0x20] sm:$0xff] %v806_v37  ;;  %v807_v41 = vadd.f32 %v758_v40, %v622_v36  ;;  %v861_v5 = vadd.f32 (!%p1086_p2), %v1087_v3, %v838_v2  ;;  %v841_v8 = vld [vmem:[#allocation2 + $0x18] sm:$0xff] (!%p1086_p2) }
 0x279   : > { %825 = vst [vmem:[#allocation2 + $0x38] sm:$0xff] %v809_v39  ;;  %v839_v4 = vld [vmem:[#allocation2 + $0x8] sm:$0xff] (!%p1086_p2)  ;;  %v864_v11 = vadd.f32 (!%p1086_p2), %v1087_v3, %v841_v8  ;;  %879 = vst [vmem:[%s1896_s25 + $0x10] sm:$0xff] (!%p1086_p2), %v863_v10 }
 0x27a   : > { %823 = vst [vmem:[#allocation2 + $0x28] sm:$0xff] %v807_v41  ;;  %v862_v6 = vadd.f32 (!%p1086_p2), %v1087_v3, %v839_v4  ;;  %877 = vst [vmem:[%s1896_s25] sm:$0xff] (!%p1086_p2), %v861_v5 }
 0x27b   : > { %880 = vst [vmem:[%s1896_s25 + $0x18] sm:$0xff] (!%p1086_p2), %v864_v11 }
 0x27c   : > { %v1186_v44 = vpop.f32.mrb[8].mxu1  ;;  %878 = vst [vmem:[%s1896_s25 + $0x8] sm:$0xff] (!%p1086_p2), %v862_v6 }
 0x27d   : > { %v812_v46 = vadd.f32 %v1186_v44, %v627_v42  ;;  %v771_v47 = vpop.f32.mrb[9].mxu1 }
 0x27e   : > { %v810_v49 = vadd.f32 %v771_v47, %v625_v43  ;;  %v1187_v50 = vpop.f32.mrb[10].mxu1  ;;  %v844_v14 = vld [vmem:[#allocation2 + $0x30] sm:$0xff] (!%p1086_p2) }
 0x27f   : > { %828 = vst [vmem:[#allocation2 + $0x50] sm:$0xff] %v812_v46  ;;  %v813_v51 = vadd.f32 %v1187_v50, %v628_v45  ;;  %v774_v52 = vpop.f32.mrb[11].mxu1  ;;  %v842_v9 = vld [vmem:[#allocation2 + $0x20] sm:$0xff] (!%p1086_p2)  ;;  %v867_v17 = vadd.f32 (!%p1086_p2), %v1087_v3, %v844_v14 }
 0x280   : > { %826 = vst [vmem:[#allocation2 + $0x40] sm:$0xff] %v810_v49  ;;  %v811_v53 = vadd.f32 %v774_v52, %v626_v48  ;;  %v865_v12 = vadd.f32 (!%p1086_p2), %v1087_v3, %v842_v9  ;;  %v845_v15 = vld [vmem:[#allocation2 + $0x38] sm:$0xff] (!%p1086_p2) }
 0x281   : > { %829 = vst [vmem:[#allocation2 + $0x58] sm:$0xff] %v813_v51  ;;  %v843_v13 = vld [vmem:[#allocation2 + $0x28] sm:$0xff] (!%p1086_p2)  ;;  %v868_v18 = vadd.f32 (!%p1086_p2), %v1087_v3, %v845_v15  ;;  %883 = vst [vmem:[%s1896_s25 + $0x30] sm:$0xff] (!%p1086_p2), %v867_v17 }
 0x282   : > { %827 = vst [vmem:[#allocation2 + $0x48] sm:$0xff] %v811_v53  ;;  %v866_v16 = vadd.f32 (!%p1086_p2), %v1087_v3, %v843_v13  ;;  %881 = vst [vmem:[%s1896_s25 + $0x20] sm:$0xff] (!%p1086_p2), %v865_v12 }
 0x283   : > { %884 = vst [vmem:[%s1896_s25 + $0x38] sm:$0xff] (!%p1086_p2), %v868_v18 }
 0x284   : > { %v1190_v56 = vpop.f32.mrb[12].mxu1  ;;  %837 = sbr.rel (%p1086_p2) target bundleno = 661 (0x295), region = 60  ;;  %882 = vst [vmem:[%s1896_s25 + $0x28] sm:$0xff] (!%p1086_p2), %v866_v16 }
 0x285   : > { %v816_v58 = vadd.f32 %v1190_v56, %v631_v54  ;;  %v787_v59 = vpop.f32.mrb[13].mxu1 }
 0x286   : > { %v814_v61 = vadd.f32 %v787_v59, %v629_v55  ;;  %v1191_v62 = vpop.f32.mrb[14].mxu1  ;;  %v848_v21 = vld [vmem:[#allocation2 + $0x50] sm:$0xff] (!%p1086_p2) }
 0x287   : > { %832 = vst [vmem:[#allocation2 + $0x70] sm:$0xff] %v816_v58  ;;  %v817_v63 = vadd.f32 %v1191_v62, %v632_v57  ;;  %v790_v0 = vpop.f32.mrb[15].mxu1  ;;  %v846_v19 = vld [vmem:[#allocation2 + $0x40] sm:$0xff] (!%p1086_p2)  ;;  %v871_v24 = vadd.f32 (!%p1086_p2), %v1087_v3, %v848_v21 }
 0x288   : > { %830 = vst [vmem:[#allocation2 + $0x60] sm:$0xff] %v814_v61  ;;  %v815_v1 = vadd.f32 %v790_v0, %v630_v60  ;;  %v869_v22 = vadd.f32 (!%p1086_p2), %v1087_v3, %v846_v19  ;;  %v849_v26 = vld [vmem:[#allocation2 + $0x58] sm:$0xff] (!%p1086_p2) }
 0x289   : > { %833 = vst [vmem:[#allocation2 + $0x78] sm:$0xff] %v817_v63  ;;  %v847_v20 = vld [vmem:[#allocation2 + $0x48] sm:$0xff] (!%p1086_p2)  ;;  %v872_v25 = vadd.f32 (!%p1086_p2), %v1087_v3, %v849_v26  ;;  %887 = vst [vmem:[%s1896_s25 + $0x50] sm:$0xff] (!%p1086_p2), %v871_v24 }
 0x28a   : > { %831 = vst [vmem:[#allocation2 + $0x68] sm:$0xff] %v815_v1  ;;  %v870_v23 = vadd.f32 (!%p1086_p2), %v1087_v3, %v847_v20  ;;  %885 = vst [vmem:[%s1896_s25 + $0x40] sm:$0xff] (!%p1086_p2), %v869_v22 }
 0x28b   : > { %888 = vst [vmem:[%s1896_s25 + $0x58] sm:$0xff] %v872_v25 }
 0x28c   : > { %886 = vst [vmem:[%s1896_s25 + $0x48] sm:$0xff] %v870_v23 }
 0x28e   : > { %v852_v31 = vld [vmem:[#allocation2 + $0x70] sm:$0xff] }
 0x28f   : > { %v850_v27 = vld [vmem:[#allocation2 + $0x60] sm:$0xff]  ;;  %v875_v33 = vadd.f32 %v1087_v3, %v852_v31 }
 0x290   : > { %v873_v29 = vadd.f32 %v1087_v3, %v850_v27  ;;  %v853_v32 = vld [vmem:[#allocation2 + $0x78] sm:$0xff] }
 0x291   : > { %v851_v28 = vld [vmem:[#allocation2 + $0x68] sm:$0xff]  ;;  %v876_v34 = vadd.f32 %v1087_v3, %v853_v32  ;;  %891 = vst [vmem:[%s1896_s25 + $0x70] sm:$0xff] %v875_v33 }
 0x292   : > { %v874_v30 = vadd.f32 %v1087_v3, %v851_v28  ;;  %889 = vst [vmem:[%s1896_s25 + $0x60] sm:$0xff] %v873_v29 }
 0x293   : > { %892 = vst [vmem:[%s1896_s25 + $0x78] sm:$0xff] %v876_v34 }
 0x294   : > { %890 = vst [vmem:[%s1896_s25 + $0x68] sm:$0xff] %v874_v30 }
 0x295 PF: > { %s2073_s24 = sld [smem:[#allocation15_spill]]  ;;  %s907_s23 = sshll.u32 %s1896_s25, 4  ;;  %s1955_s23 = int_to_ptr.vmem [resolvable:$true] %s907_s23 }
 0x296   : > { %s2074_s7 = sld [smem:[#allocation23_spill]]  ;;  %s894_s4 = scalar_lea.sflag [#allocation5], %s1867_s1 }
 0x297   : > { %s1424_s15 = scalar_lea.vmem %s1955_s23, 2048  ;;  %p2075_p11 = scmp.ne.s32.totalorder %s2060_s14, 0 }
 0x298   : > { %p1425_p13 = scmp.ne.s32.totalorder %s1955_s23, %s1424_s15  ;;  %s1559_s30 = smov [#allocation9]  }
 0x299   : > { %s1428_s13 = sshll.u32 %s1559_s30, 4  ;;  %s1429_s13 = int_to_ptr.vmem [resolvable:$false] %s1428_s13 }
 0x29a   : > { %p1426_p6 = pnand %p1425_p13, %p2075_p11  ;;  %s1430_s12 = scalar_lea.vmem %s1429_s13, 4096 }
 0x29b   : > { %s1095_s11 = sshll.u32 %s2073_s24, 11  ;;  %p1431_p1 = scmp.lt.s32.totalorder %s1955_s23, %s1429_s13 }
 0x29c   : > { %s1952_s8 = scalar_lea.hbm %s2074_s7, %s1095_s11  ;;  %p1427_p5 = pneg %p1426_p6 }
 0x29d   : > { %p1432_p0 = scmp.lt.s32.totalorder %s1430_s12, %s1424_s15 }
 0x29f   : > { %p1433_p9 = por %p1432_p0, %p1431_p1 }
 0x2a1   : > { %p1434_p12 = pnand %p1433_p9, %p1427_p5 }
 0x2a3   : > { %1437 = shalt.err (!%p1434_p12)
}
 0x2a4   : > { %s1438_s10 = scalar_lea.hbm %s1952_s8, 2048  ;;  %s1442_s17 = scalar_lea.hbm %s2074_s7, 4096 }
 0x2a5   : > { %p1439_p3 = scmp.ne.s32.totalorder %s1952_s8, %s1438_s10  ;;  %p1443_p8 = scmp.lt.u32.totalorder %s1952_s8, %s2074_s7 }
 0x2a6   : > { %p1444_p10 = scmp.lt.u32.totalorder %s1442_s17, %s1438_s10  ;;  %p1446_p13 = scmp.lt.u32.totalorder %s1438_s10, %s1952_s8 }
 0x2a7   : > { %p1440_p4 = pnand %p1439_p3, %p2075_p11 }
 0x2a8   : > { %p1445_p2 = por %p1444_p10, %p1443_p8 }
 0x2a9   : > { %p1441_p7 = pneg %p1440_p4 }
 0x2aa   : > { %p1447_p6 = por %p1446_p13, %p1445_p2 }
 0x2ac   : > { %p1448_p5 = pnand %p1447_p6, %p1441_p7 }
 0x2ae   : > { %1451 = shalt.err (!%p1448_p5)
}
 0x2af   : > { %s1560_s16 = smov 128   ;;  %s1561_s27 = smov 8  }
 0x2b0   : > { %1198 = dma.vmem_to_hbm [thread:$0]  (%p2075_p11), %s1955_s23, 2048, %s1952_s8, %s894_s4, %s1560_s16, %s1560_s16, %s1561_s27  }
 0x2b1 PF: > { %p1215_p1 = scmp.ge.s32.totalorder %s1550_s28, 2  ;;  %s922_s24 = sand.u32 1, %s1522_s21  }
 0x2b2   : > { %p2076_p0 = scmp.ne.s32.totalorder %s2062_s5, 0  ;;  %s923_s11 = scalar_lea.sflag [#allocation5], %s922_s24 }
 0x2b4   : > { %p1211_p9 = pnand %p1215_p1, %p2076_p0 }
 0x2b6   : > { %1505 = dma.done.wait (!%p1211_p9), %s923_s11, 2048  }
 0x2b7   : > { %1507 = vsyncadd (!%p1211_p9), %s923_s11, 4294965248  ;;  %s24_s28 = sadd.s32 1, %s1550_s28   ;;  %s2077_s29 = sld [smem:[#allocation13_spill]] }
 0x2b8   : > { %p21_p12 = scmp.ge.s32.totalorder %s24_s28, 6   ;;  %s2078_s20 = sld [smem:[#allocation18_spill]] }
 0x2b9   : > { %s2079_s14 = sld [smem:[#allocation14_spill]]  ;;  %s2080_s23 = sld [smem:[#allocation20_spill]] }
 0x2ba   : > { %s2081_s25 = sld [smem:[#allocation16_spill]]  ;;  %s2082_s1 = sld [smem:[#allocation17_spill]] }
 0x2bb   : > { %s2083_s27 = sld [smem:[#allocation19_spill]]  ;;  %s2084_s18 = smov %s1514_s19 }
 0x2bc   : > { %s2086_s21 = smov %s1526_s22  ;;  %s2088_s24 = smov %s1542_s26 }
 0x2bd   : > { %s2085_s19 = smov %s2077_s29  ;;  %23 = sbr.rel (!%p21_p12) target bundleno = 15 (0xf), region = 120 }
 0x2bf   : > { %s2087_s22 = smov %s2079_s14 }
 0x2c0   : > { %s2089_s26 = smov %s2082_s1 }
 0x2c4   :  { %928 = vsyncpa [#allocation4], 1 }
 0x2c5   :  { %930 = vsyncpa [#allocation4 + $0x1], 1 }
 0x2c6   :  { %931 = vsyncpa [#allocation7], 1 }
 0x2c7   :  { %933 = vsyncpa [#allocation7 + $0x1], 1 }
 0x2c8   :  { %934 = vsyncpa [#allocation5], 1 }
 0x2c9   :  { %936 = vsyncpa [#allocation5 + $0x1], 1 }

</bundles_post_ra>
